<compile_context>
chip_gen: v7x
topology: tpu7x:2x2x1
jax: 0.10.0
libtpu: 0.0.40
codegen_flags: <defaults>
</compile_context>

<pallas_src>
import jax
import jax.numpy as jnp
from jax.experimental import pallas as pl
from jax.experimental.pallas import tpu as pltpu


def _round_up(x, m):
    return (x + m - 1) // m * m


# ---------- Pass 1: K-tiled im2col matmul + per-tile partial BN statistics ----------
def conv_stats_kernel(p_ref, w_ref, conv_ref, pstats_ref, acc_ref):
    """Grid = (M tiles, K tiles).

    p_ref:      (tm, tk)   bf16 im2col patches
    w_ref:      (tk, Cp)   bf16 reshaped weights
    conv_ref:   (tm, Cp)   bf16 conv output tile (written at last K step)
    pstats_ref: (1, 2, Cp) f32 per-tile [sum; sum-of-squares] (written at last K step)
    acc_ref:    (tm, Cp)   f32 accumulator scratch
    """
    kk = pl.program_id(1)

    @pl.when(kk == 0)
    def _():
        acc_ref[...] = jnp.zeros_like(acc_ref)

    acc_ref[...] += jnp.dot(p_ref[...], w_ref[...],
                            preferred_element_type=jnp.float32)

    @pl.when(kk == pl.num_programs(1) - 1)
    def _():
        acc = acc_ref[...]
        conv_ref[...] = acc.astype(conv_ref.dtype)
        s = jnp.sum(acc, axis=0, keepdims=True)
        sq = jnp.sum(acc * acc, axis=0, keepdims=True)
        pstats_ref[...] = jnp.concatenate([s, sq], axis=0)[None]


# ---------- Pass 2: streaming folded-BN FMA + Hardswish ----------
def bn_hswish_kernel(conv_ref, scale_ref, bias_ref, o_ref):
    """conv_ref (tm, Cp) bf16; scale/bias (1, Cp) f32; o_ref (tm, Cp) f32."""
    y = conv_ref[...].astype(jnp.float32) * scale_ref[...] + bias_ref[...]
    # Hardswish: x * relu6(x + 3) / 6
    o_ref[...] = (y * jnp.clip(y + 3.0, 0.0, 6.0) * (1.0 / 6.0)).astype(o_ref.dtype)


def conv_bn_layer(x_nchw, weight_oihw, gamma, beta, stride, eps=1e-5):
    """Forward pass of ConvBNLayer. Input/output are NCHW like PyTorch."""
    n, cin, h, w = x_nchw.shape
    cout, cin_w, kh, kw = weight_oihw.shape
    # TODO(synk): grouped conv (num_groups > 1) not implemented; groups=1 (default) only.
    assert cin == cin_w, "only num_groups=1 supported"
    pad = (kh - 1) // 2
    ho = (h + 2 * pad - kh) // stride + 1
    wo = (w + 2 * pad - kw) // stride + 1

    m = n * ho * wo
    k = kh * kw * cin

    # ---- tile selection: lane-dense channels, VMEM-budget & megacore aware ----
    cp = _round_up(cout, 128)               # lane-dense output channels
    kp0 = _round_up(k, 128)                 # lane/sublane-aligned contraction
    tm = min(512, _round_up(m, 8))
    if pl.cdiv(m, tm) < 2 and tm > 8:       # >= 2 M tiles so both v7x TCs get work
        tm = _round_up(max(tm // 2, 8), 8)
    tk = min(kp0, 512)

    def pass1_vmem(tm_, tk_):
        return (2 * tm_ * tk_ * 2           # bf16 patches, double-buffered
                + 2 * tk_ * cp * 2          # bf16 weights, double-buffered
                + 2 * tm_ * cp * 2          # bf16 conv tile, double-buffered
                + 2 * 2 * cp * 4            # f32 stats tile, double-buffered
                + tm_ * cp * 4)             # f32 accumulator scratch

    budget = 12 * 1024 * 1024               # fits v5e's 16 MiB scoped-VMEM default
    while pass1_vmem(tm, tk) > budget and tk > 128:
        tk //= 2
    while pass1_vmem(tm, tk) > budget and tm > 8:
        tm = _round_up(max(tm // 2, 8), 8)

    kp = _round_up(kp0, tk)
    kt = kp // tk
    mp = _round_up(m, tm)
    mt = mp // tm

    # ---- glue: layout changes, padding, im2col -- all bf16 (MXU operand dtype) ----
    x_nhwc = jnp.transpose(x_nchw, (0, 2, 3, 1)).astype(jnp.bfloat16)
    x_pad = jnp.pad(x_nhwc, ((0, 0), (pad, pad), (pad, pad), (0, 0)))
    taps = []
    for kh_i in range(kh):
        for kw_i in range(kw):
            taps.append(x_pad[:, kh_i:kh_i + (ho - 1) * stride + 1:stride,
                              kw_i:kw_i + (wo - 1) * stride + 1:stride, :])
    patches = jnp.concatenate(taps, axis=-1).reshape(m, k)
    # Zero padding is exact: padded rows/cols contribute 0 to conv and to BN sums.
    patches = jnp.pad(patches, ((0, mp - m), (0, kp - k)))

    w_mat = jnp.transpose(weight_oihw, (2, 3, 1, 0)).reshape(k, cout)
    w_mat = jnp.pad(w_mat, ((0, kp - k), (0, cp - cout))).astype(jnp.bfloat16)

    vmem_limit = 48 * 1024 * 1024

    # ---- pass 1: conv tiles (bf16 out) + per-tile partial BN stats ----
    flops1 = 2 * mp * kp * cp
    bytes1 = mp * kp * 2 + mt * kp * cp * 2 + mp * cp * 2 + mt * 2 * cp * 4
    conv_out, pstats = pl.pallas_call(
        conv_stats_kernel,
        out_shape=(jax.ShapeDtypeStruct((mp, cp), jnp.bfloat16),
                   jax.ShapeDtypeStruct((mt, 2, cp), jnp.float32)),
        grid=(mt, kt),
        in_specs=[pl.BlockSpec((tm, tk), lambda i, kk: (i, kk)),
                  pl.BlockSpec((tk, cp), lambda i, kk: (kk, 0))],
        out_specs=(pl.BlockSpec((tm, cp), lambda i, kk: (i, 0)),
                   pl.BlockSpec((1, 2, cp), lambda i, kk: (i, 0, 0))),
        scratch_shapes=[pltpu.VMEM((tm, cp), jnp.float32)],
        compiler_params=pltpu.CompilerParams(
            dimension_semantics=("parallel", "arbitrary"),
            vmem_limit_bytes=vmem_limit),
        cost_estimate=pl.CostEstimate(flops=flops1, transcendentals=0,
                                      bytes_accessed=bytes1),
    )(patches, w_mat)

    # ---- finalize BN stats ONCE (tiny plain-JAX step), fold BN into scale/bias ----
    inv_m = 1.0 / float(m)
    ssum = jnp.sum(pstats[:, 0, :], axis=0)          # (Cp,)
    ssq = jnp.sum(pstats[:, 1, :], axis=0)           # (Cp,)
    mean = ssum * inv_m
    var = jnp.maximum(ssq * inv_m - mean * mean, 0.0)
    g_p = jnp.pad(gamma.astype(jnp.float32), (0, cp - cout))
    b_p = jnp.pad(beta.astype(jnp.float32), (0, cp - cout))
    scale_v = g_p * jax.lax.rsqrt(var + eps)
    bias_v = b_p - mean * scale_v
    scale2 = scale_v.reshape(1, cp)
    bias2 = bias_v.reshape(1, cp)

    # ---- pass 2: pure streaming FMA + Hardswish ----
    flops2 = 6 * mp * cp
    bytes2 = mp * cp * 2 + mp * cp * 4 + 2 * cp * 4
    out_flat = pl.pallas_call(
        bn_hswish_kernel,
        out_shape=jax.ShapeDtypeStruct((mp, cp), jnp.float32),
        grid=(mt,),
        in_specs=[pl.BlockSpec((tm, cp), lambda i: (i, 0)),
                  pl.BlockSpec((1, cp), lambda i: (0, 0)),
                  pl.BlockSpec((1, cp), lambda i: (0, 0))],
        out_specs=pl.BlockSpec((tm, cp), lambda i: (i, 0)),
        compiler_params=pltpu.CompilerParams(
            dimension_semantics=("parallel",),
            vmem_limit_bytes=vmem_limit),
        cost_estimate=pl.CostEstimate(flops=flops2, transcendentals=0,
                                      bytes_accessed=bytes2),
    )(conv_out, scale2, bias2)

    out = out_flat[:m, :cout].reshape(n, ho, wo, cout)
    return jnp.transpose(out, (0, 3, 1, 2))


def _reference(x_nchw, weight_oihw, gamma, beta, stride, eps=1e-5):
    """Pure-JAX reference matching the PyTorch module (training-mode BN)."""
    kk = weight_oihw.shape[2]
    pad = (kk - 1) // 2
    conv = jax.lax.conv_general_dilated(
        x_nchw.astype(jnp.float32), weight_oihw.astype(jnp.float32),
        window_strides=(stride, stride), padding=[(pad, pad), (pad, pad)],
        dimension_numbers=("NCHW", "OIHW", "NCHW"))
    mean = conv.mean(axis=(0, 2, 3), keepdims=True)
    var = ((conv - mean) ** 2).mean(axis=(0, 2, 3), keepdims=True)
    y = (conv - mean) * jax.lax.rsqrt(var + eps)
    y = y * gamma.reshape(1, -1, 1, 1) + beta.reshape(1, -1, 1, 1)
    return y * jnp.clip(y + 3.0, 0.0, 6.0) / 6.0


if __name__ == "__main__":
    # Module config (deterministic, synthetic params).
    num_channels, num_filters, filter_size, stride = 4, 8, 3, 2
    N, H, W = 2, 16, 16

    key = jax.random.PRNGKey(0)
    kx, kw_, kg, kb = jax.random.split(key, 4)
    x = jax.random.normal(kx, (N, num_channels, H, W), dtype=jnp.float32)
    weight = 0.1 * jax.random.normal(
        kw_, (num_filters, num_channels, filter_size, filter_size), dtype=jnp.float32)
    gamma = 1.0 + 0.1 * jax.random.normal(kg, (num_filters,), dtype=jnp.float32)
    beta = 0.1 * jax.random.normal(kb, (num_filters,), dtype=jnp.float32)

    out = conv_bn_layer(x, weight, gamma, beta, stride)
    out = jax.block_until_ready(out)

    ref = _reference(x, weight, gamma, beta, stride)
    assert out.shape == ref.shape, (out.shape, ref.shape)
    # bf16 MXU operands + bf16 conv intermediate (f32 accumulation/stats) ->
    # tolerance relaxed vs the pure-f32 reference.
    assert jnp.allclose(out, ref, atol=3e-2, rtol=3e-2), "mismatch vs reference"

    print("KERNEL_OK")
</pallas_src>

<mosaic_0001>
module attributes {stable_mosaic.version = 11 : i64} {
  func.func @conv_stats_kernel(%arg0: i32, %arg1: i32, %arg2: memref<64x128xbf16, #tpu.memory_space<vmem>>, %arg3: memref<128x128xbf16, #tpu.memory_space<vmem>>, %arg4: memref<64x128xbf16, #tpu.memory_space<vmem>>, %arg5: memref<1x2x128xf32, #tpu.memory_space<vmem>>, %arg6: memref<64x128xf32, #tpu.memory_space<vmem>>) attributes {dimension_semantics = [#tpu.dimension_semantics<parallel>, #tpu.dimension_semantics<arbitrary>], iteration_bounds = array<i64: 2, 1>, scalar_prefetch = 0 : i64, scratch_operands = 1 : i64, tpu.core_type = #tpu.core_type<tc>, window_params = [{transform_indices = @transform_0, window_bounds = array<i64: 64, 128>}, {transform_indices = @transform_1, window_bounds = array<i64: 128, 128>}, {transform_indices = @transform_2, window_bounds = array<i64: 64, 128>}, {transform_indices = @transform_3, window_bounds = array<i64: 1, 2, 128>}]} {
    %c0_i32 = arith.constant 0 : i32
    %0 = arith.cmpi eq, %arg1, %c0_i32 : i32
    %1 = arith.extui %0 : i1 to i32
    %c0_i32_0 = arith.constant 0 : i32
    %2 = arith.cmpi ne, %1, %c0_i32_0 : i32
    scf.if %2 {
      %cst_10 = arith.constant 0.000000e+00 : f32
      %12 = vector.broadcast %cst_10 : f32 to vector<64x128xf32>
      %c0_11 = arith.constant 0 : index
      %c0_12 = arith.constant 0 : index
      %13 = vector.load %arg6[%c0_11, %c0_12] : memref<64x128xf32, #tpu.memory_space<vmem>>, vector<64x128xf32>
      tpu.vector_store %arg6[%c0_11, %c0_12], %12 {strides = array<i32>} : memref<64x128xf32, #tpu.memory_space<vmem>>, vector<64x128xf32>,
    } else {
    }
    %c0 = arith.constant 0 : index
    %c0_1 = arith.constant 0 : index
    %3 = vector.load %arg6[%c0, %c0_1] : memref<64x128xf32, #tpu.memory_space<vmem>>, vector<64x128xf32>
    %c0_2 = arith.constant 0 : index
    %c0_3 = arith.constant 0 : index
    %4 = vector.load %arg2[%c0_2, %c0_3] : memref<64x128xbf16, #tpu.memory_space<vmem>>, vector<64x128xbf16>
    %c0_4 = arith.constant 0 : index
    %c0_5 = arith.constant 0 : index
    %5 = vector.load %arg3[%c0_4, %c0_5] : memref<128x128xbf16, #tpu.memory_space<vmem>>, vector<128x128xbf16>
    %cst = arith.constant dense<0.000000e+00> : vector<64x128xf32>
    %6 = tpu.matmul %4, %5, %cst {dimension_numbers = #tpu.dot_dimension_numbers<[1], [0], [0], [1], [0, 0, 1, 1], [], []>} : vector<64x128xbf16>, vector<128x128xbf16>, vector<64x128xf32> -> vector<64x128xf32>
    %7 = arith.addf %3, %6 : vector<64x128xf32>
    %c0_6 = arith.constant 0 : index
    %c0_7 = arith.constant 0 : index
    %8 = vector.load %arg6[%c0_6, %c0_7] : memref<64x128xf32, #tpu.memory_space<vmem>>, vector<64x128xf32>
    tpu.vector_store %arg6[%c0_6, %c0_7], %7 {strides = array<i32>} : memref<64x128xf32, #tpu.memory_space<vmem>>, vector<64x128xf32>,
    %c0_i32_8 = arith.constant 0 : i32
    %9 = arith.cmpi eq, %arg1, %c0_i32_8 : i32
    %10 = arith.extui %9 : i1 to i32
    %c0_i32_9 = arith.constant 0 : i32
    %11 = arith.cmpi ne, %10, %c0_i32_9 : i32
    scf.if %11 {
      %c0_10 = arith.constant 0 : index
      %c0_11 = arith.constant 0 : index
      %12 = vector.load %arg6[%c0_10, %c0_11] : memref<64x128xf32, #tpu.memory_space<vmem>>, vector<64x128xf32>
      %13 = arith.truncf %12 : vector<64x128xf32> to vector<64x128xbf16>
      %c0_12 = arith.constant 0 : index
      %c0_13 = arith.constant 0 : index
      %14 = vector.load %arg4[%c0_12, %c0_13] : memref<64x128xbf16, #tpu.memory_space<vmem>>, vector<64x128xbf16>
      tpu.vector_store %arg4[%c0_12, %c0_13], %13 {strides = array<i32>} : memref<64x128xbf16, #tpu.memory_space<vmem>>, vector<64x128xbf16>,
      %cst_14 = arith.constant dense<0.000000e+00> : vector<128xf32>
      %15 = vector.multi_reduction <add>, %12, %cst_14 [0] : vector<64x128xf32> to vector<128xf32>
      %16 = vector.shape_cast %15 : vector<128xf32> to vector<1x128xf32>
      %17 = arith.mulf %12, %12 : vector<64x128xf32>
      %cst_15 = arith.constant dense<0.000000e+00> : vector<128xf32>
      %18 = vector.multi_reduction <add>, %17, %cst_15 [0] : vector<64x128xf32> to vector<128xf32>
      %19 = vector.shape_cast %18 : vector<128xf32> to vector<1x128xf32>
      %20 = tpu.concatenate %16, %19 in 0 : vector<1x128xf32>, vector<1x128xf32> -> vector<2x128xf32>
      %21 = vector.shape_cast %20 : vector<2x128xf32> to vector<1x2x128xf32>
      %c0_16 = arith.constant 0 : index
      %c0_17 = arith.constant 0 : index
      %c0_18 = arith.constant 0 : index
      %22 = vector.load %arg5[%c0_16, %c0_17, %c0_18] : memref<1x2x128xf32, #tpu.memory_space<vmem>>, vector<1x2x128xf32>
      tpu.vector_store %arg5[%c0_16, %c0_17, %c0_18], %21 {strides = array<i32>} : memref<1x2x128xf32, #tpu.memory_space<vmem>>, vector<1x2x128xf32>,
    } else {
    }
    return
  }
  func.func @transform_0(%arg0: i32, %arg1: i32) -> (i32, i32) {
    %c0_i32 = arith.constant 0 : i32
    return %arg0, %arg1 : i32, i32
  }
  func.func @transform_1(%arg0: i32, %arg1: i32) -> (i32, i32) {
    %c0_i32 = arith.constant 0 : i32
    %c0_i32_0 = arith.constant 0 : i32
    return %arg1, %c0_i32 : i32, i32
  }
  func.func @transform_2(%arg0: i32, %arg1: i32) -> (i32, i32) {
    %c0_i32 = arith.constant 0 : i32
    %c0_i32_0 = arith.constant 0 : i32
    return %arg0, %c0_i32 : i32, i32
  }
  func.func @transform_3(%arg0: i32, %arg1: i32) -> (i32, i32, i32) {
    %c0_i32 = arith.constant 0 : i32
    %c0_i32_0 = arith.constant 0 : i32
    %c0_i32_1 = arith.constant 0 : i32
    return %arg0, %c0_i32, %c0_i32_0 : i32, i32, i32
  }
}

</mosaic_0001>

<bundles_post_ra>
// kernel: tpu_custom_call.1
= control target key start
LH: loop header
LB: loop body
LE: loop exit
PB: predicated region body
PF: predicated region fallthrough
CT: control target
= control target key end

     0   :  { %9 = vsyncpa [#allocation4], 0  ;;  %s1383_s0 = inlined_call_operand.hbm [shape: bf16[128,128], index: 0, kind: input, shape index: {}]   ;;  %s1384_s1 = inlined_call_operand.hbm [shape: bf16[128,128], index: 1, kind: input, shape index: {}]   ;;  %s1385_s2 = inlined_call_operand.hbm [shape: bf16[128,128], index: 2, kind: output, shape index: {0}]   ;;  %s1386_s3 = inlined_call_operand.hbm [shape: f32[2,2,128], index: 3, kind: output, shape index: {1}]  }
   0x1   :  { %11 = vsyncpa [#allocation4 + $0x1], 0 }
   0x2   :  { %12 = vsyncpa [#allocation7], 0 }
   0x3   :  { %13 = vsyncpa [#allocation5], 0 }
   0x4   :  { %15 = vsyncpa [#allocation5 + $0x1], 0 }
   0x5   :  { %16 = vsyncpa [#allocation10], 0 }
   0x6   :  { %18 = vsyncpa [#allocation10 + $0x1], 0  ;;  %s1111_s12 = smov 0   ;;  %s1113_s13 = smov 0  }
   0x7   :  { %s1115_s14 = smov 0   ;;  %s1117_s15 = smov 0  }
   0x8   :  { %s1119_s16 = smov 0   ;;  %s1121_s17 = smov 0  }
   0x9 LB: > { %s686_s18 = sadd.s32 4294967295, %s1081_s17   ;;  %s687_s19 = sadd.s32 4294967294, %s1081_s17   ;;  %s1081_s17 = sphi %s1121_s17, %s24_s17   ;;  %s1077_s16 = sphi %s1119_s16, %s1410_s16   ;;  %s1073_s15 = sphi %s1117_s15, %s1409_s15   ;;  %s1069_s14 = sphi %s1115_s14, %s1408_s14   ;;  %s1065_s13 = sphi %s1113_s13, %s1407_s13   ;;  %s1061_s12 = sphi %s1111_s12, %s1406_s12  }
   0xa   : > { %p58_p0 = scmp.ne.s32.totalorder %s1065_s13, %s1061_s12  ;;  %p1145_p1 = scmp.eq.s32.totalorder %s686_s18, 0 }
   0xb   : > { %p1149_p2 = scmp.eq.s32.totalorder %s686_s18, 1  ;;  %p114_p3 = scmp.eq.s32.totalorder %s687_s19, 1 }
   0xc   : > { %s1391_s20 = scalar_select %p1145_p1, 1, 0 }
   0xd   : > { %s1392_s21 = scalar_select %p1149_p2, 1, 0 }
   0xe   : > { %p1155_p4 = por %p1145_p1, %p58_p0  ;;  %p688_p5 = scmp.ge.s32.totalorder %s1081_s17, 1 }
   0xf   : > { %p1160_p6 = por %p114_p3, %p58_p0  ;;  %p147_p7 = scmp.lt.s32.totalorder %s1081_s17, 3 }
  0x10   : > { %s1393_s22 = scalar_select %p1155_p4, 1, 0 }
  0x11   : > { %s1394_s23 = scalar_select %p1160_p6, 1, 0 }
  0x12   : > { %p1165_p8 = pnand %p688_p5, %p147_p7  ;;  %s1083_s25 = smov [#allocation6]  }
  0x13   : > { %s162_s26 = sshll.u32 %s1083_s25, 4  ;;  %s36_s28 = sadd.s32 1, %s1077_s16  ;;  %s163_s26 = int_to_ptr.vmem [resolvable:$true] %s162_s26 }
  0x14   : > { %s1395_s24 = scalar_select %p1165_p8, 1, 0 }
  0x15   : > { %p821_p9 = pneg %p1165_p8  ;;  %s905_s4 = scalar_lea.hbm %s1384_s1, 1024 }
  0x16   : > { %p906_p12 = scmp.ne.s32.totalorder %s1384_s1, %s905_s4  ;;  %p912_p5 = scmp.lt.u32.totalorder %s905_s4, %s1384_s1 }
  0x17   : > { %p1174_p11 = pnand %p821_p9, %p1145_p1 }
  0x19   : > { %p907_p13 = pneg %p1174_p11 }
  0x1b   : > { %p908_p0 = pnand %p907_p13, %p906_p12 }
  0x1d   : > { %p909_p3 = pneg %p908_p0 }
  0x1f   : > { %p914_p7 = pnand %p912_p5, %p909_p3 }
  0x21   : > { %917 = shalt.err (!%p914_p7)
}
  0x22   : > { %s918_s9 = scalar_lea.vmem %s163_s26, 1024  ;;  %p926_p1 = scmp.lt.s32.totalorder %s163_s26, %s163_s26 }
  0x23   : > { %p919_p9 = scmp.ne.s32.totalorder %s163_s26, %s918_s9  ;;  %p927_p4 = scmp.lt.s32.totalorder %s918_s9, %s918_s9 }
  0x25   : > { %p921_p10 = pnand %p919_p9, %p907_p13  ;;  %p928_p8 = por %p927_p4, %p926_p1 }
  0x27   : > { %p922_p6 = pneg %p921_p10 }
  0x29   : > { %p929_p2 = pnand %p928_p8, %p922_p6 }
  0x2b   : > { %932 = shalt.err (!%p929_p2)
}
  0x2c   : > { %s1084_s10 = smov 64   ;;  %s1085_s11 = smov 4  }
  0x2d   : > { %824 = dma.hbm_to_vmem [thread:$0]  (!%p1174_p11), %s1384_s1, 1024, %s163_s26, [#allocation7], %s1084_s10, %s1084_s10, %s1085_s11  }
  0x2e   : > { %p38_p1 = scmp.ge.s32.totalorder %s36_s28, 2  ;;  %s45_s25 = sadd.s32 1, %s1069_s14 }
  0x2f   : > { %p52_p2 = scmp.ne.s32.totalorder %s1069_s14, %s1065_s13  ;;  %p53_p4 = scmp.eq.s32.totalorder %s1081_s17, 0 }
  0x30   : > { %s1412_s28 = smov (%p38_p1, %s36_s28), 0  ;;  %p1398_p8 = scmp.ne.s32.totalorder %s1392_s21, 0 }
  0x31   : > { %p1204_p6 = por %p53_p4, %p52_p2  ;;  %s40_s30 = ssub.s32 %s1077_s16, %s1412_s28 }
  0x32   : > { %p1210_p10 = por %p1398_p8, %p52_p2  ;;  %p837_p12 = scmp.lt.s32.totalorder %s1081_s17, 2 }
  0x33   : > { %p43_p11 = scmp.eq.s32.totalorder %s40_s30, 0  ;;  %s176_s26 = sand.u32 1, %s1069_s14  }
  0x34   : > { %s691_s4 = sshll.u32 %s176_s26, 5  ;;  %s726_s6 = sshll.u32 %s1077_s16, 9 }
  0x35   : > { %s1219_s5 = scalar_select %p43_p11, %s1069_s14, %s45_s25  }
  0x36   : > { %s1225_s9 = scalar_lea.hbm %s1383_s0, %s726_s6  ;;  %s180_s21 = scalar_lea.vmem [#allocation3], %s691_s4 }
  0x37   : > { %s188_s18 = sshll.u32 %s180_s21, 4  ;;  %p1231_p13 = pnand %p837_p12, %p1204_p6  ;;  %s1227_s18 = int_to_ptr.vmem [resolvable:$true] %s188_s18 }
  0x38   : > { %s1235_s25 = scalar_lea.sflag [#allocation4], %s176_s26  ;;  %s933_s30 = scalar_lea.hbm %s1225_s9, 512 }
  0x39   : > { %p934_p0 = scmp.ne.s32.totalorder %s1225_s9, %s933_s30  ;;  %p935_p3 = pneg %p1231_p13 }
  0x3a   : > { %s938_s29 = scalar_lea.hbm %s1383_s0, 1024  ;;  %p939_p9 = scmp.lt.u32.totalorder %s1225_s9, %s1383_s0 }
  0x3b   : > { %p936_p5 = pnand %p935_p3, %p934_p0  ;;  %p940_p1 = scmp.lt.u32.totalorder %s938_s29, %s933_s30 }
  0x3c   : > { %p942_p4 = scmp.lt.u32.totalorder %s933_s30, %s1225_s9 }
  0x3d   : > { %p937_p7 = pneg %p936_p5  ;;  %p941_p2 = por %p940_p1, %p939_p9 }
  0x3f   : > { %p943_p6 = por %p942_p4, %p941_p2 }
  0x41   : > { %p944_p8 = pnand %p943_p6, %p937_p7 }
  0x43   : > { %947 = shalt.err (!%p944_p8)
}
  0x44   : > { %s948_s26 = scalar_lea.vmem %s1227_s18, 512  ;;  %s1086_s21 = smov [#allocation3]  }
  0x45   : > { %p949_p12 = scmp.ne.s32.totalorder %s1227_s18, %s948_s26  ;;  %s953_s4 = sshll.u32 %s1086_s21, 4  ;;  %s954_s4 = int_to_ptr.vmem [resolvable:$false] %s953_s4 }
  0x46   : > { %s955_s6 = scalar_lea.vmem %s954_s4, 1024  ;;  %p956_p5 = scmp.lt.s32.totalorder %s1227_s18, %s954_s4 }
  0x47   : > { %p951_p11 = pnand %p949_p12, %p935_p3  ;;  %p957_p9 = scmp.lt.s32.totalorder %s955_s6, %s948_s26 }
  0x49   : > { %p952_p0 = pneg %p951_p11  ;;  %p958_p1 = por %p957_p9, %p956_p5 }
  0x4b   : > { %p959_p2 = pnand %p958_p1, %p952_p0 }
  0x4d   : > { %962 = shalt.err (!%p959_p2)
}
  0x4e   : > { %828 = dma.hbm_to_vmem [thread:$0]  (!%p1231_p13), %s1225_s9, 512, %s1227_s18, %s1235_s25, %s1084_s10, %s1084_s10, %s1085_s11  }
  0x4f   : > { %p1401_p3 = scmp.ne.s32.totalorder %s1395_s24, 0 }
  0x50   : > { %s1269_s30 = sand.u32 (!%p1401_p3), 1, %s1065_s13   ;;  %p1402_p7 = scmp.ne.s32.totalorder (!%p1401_p3), %s1393_s22, 0 }
  0x51   : > { %200 = sbr.rel (%p1401_p3) target bundleno = 394 (0x18a), region = 28  ;;  %s695_s29 = sshll.u32 (!%p1401_p3), %s1269_s30, 5 }
  0x52   : > { %s203_s7 = scalar_lea.sflag (!%p1401_p3), [#allocation4], %s1269_s30  ;;  %s1275_s19 = scalar_lea.vmem (!%p1401_p3), [#allocation3], %s695_s29 }
  0x58   : > { %1044 = dma.done.wait (%p1402_p7), %s203_s7, 512  }
  0x59   : > { %1046 = vsyncadd (%p1402_p7), %s203_s7, 4294966784  ;;  %p1403_p13 = scmp.ne.s32.totalorder %s1391_s20, 0 }
  0x5b   : > { %1048 = dma.done.wait (%p1403_p13), [#allocation7], 1024  }
  0x5c   : > { %1050 = vsyncadd (%p1403_p13), [#allocation7], 4294966272  ;;  %v893_v0 = vld [vmem:[#allocation6] sm:$0xff]   ;;  %v894_v1 = vld [vmem:[#allocation6 + $0x8] sm:$0xff]   ;;  %s230_s20 = scalar_lea.vmem [#allocation8], %s695_s29  ;;  %s735_s24 = sshll.u32 %s1073_s15, 9 }
  0x5d   : > { %771 = vmatprep.subr.bf16.mxu0 %v893_v0  ;;  %795 = vmatprep.subr.bf16.mxu1 %v893_v0  ;;  %v895_v2 = vld [vmem:[#allocation6 + $0x10] sm:$0xff]   ;;  %v896_v3 = vld [vmem:[#allocation6 + $0x18] sm:$0xff]   ;;  %v901_v4 = vld [vmem:[%s1275_s19] sm:$0xff]   ;;  %s546_s22 = sshll.u32 %s230_s20, 4  ;;  %s1300_s9 = scalar_lea.hbm %s1385_s2, %s735_s24  ;;  %s1294_s22 = int_to_ptr.vmem [resolvable:$true] %s546_s22 }
  0x5e   : > { %772 = vmatpush3.bf16.msra.mxu0 %v893_v0  ;;  %803 = vmatpush3.bf16.msra.mxu1 %v893_v0  ;;  %v903_v5 = vld [vmem:[%s1275_s19 + $0x10] sm:$0xff]   ;;  %v897_v6 = vld [vmem:[#allocation6 + $0x20] sm:$0xff]   ;;  %v898_v7 = vld [vmem:[#allocation6 + $0x28] sm:$0xff]   ;;  %s528_s18 = scalar_lea.sflag [#allocation5], %s1269_s30  ;;  %s963_s25 = scalar_lea.vmem %s1294_s22, 512 }
  0x5f   : > { %773 = vmatprep.subr.bf16.mxu0 %v894_v1  ;;  %796 = vmatprep.subr.bf16.mxu1 %v894_v1  ;;  %v899_v8 = vld [vmem:[#allocation6 + $0x30] sm:$0xff]   ;;  %v900_v9 = vld [vmem:[#allocation6 + $0x38] sm:$0xff]   ;;  %v902_v10 = vld [vmem:[%s1275_s19 + $0x8] sm:$0xff]   ;;  %p964_p4 = scmp.ne.s32.totalorder %s1294_s22, %s963_s25  ;;  %s1087_s8 = smov [#allocation8]  }
  0x60   : > { %787 = vmatprep.mubr.bf16.mxu0 %v901_v4  ;;  %791 = vmatprep.mubr.bf16.mxu1 %v903_v5  ;;  %v904_v11 = vld [vmem:[%s1275_s19 + $0x18] sm:$0xff]   ;;  %s967_s26 = sshll.u32 %s1087_s8, 4  ;;  %s968_s26 = int_to_ptr.vmem [resolvable:$false] %s967_s26 }
  0x61   : > { %p965_p6 = pnand %p964_p4, %p1210_p10  ;;  %s969_s21 = scalar_lea.vmem %s968_s26, 1024 }
  0x62   : > { %774 = vmatpush3.bf16.msra.mxu0 %v894_v1  ;;  %804 = vmatpush3.bf16.msra.mxu1 %v894_v1  ;;  %p970_p12 = scmp.lt.s32.totalorder %s1294_s22, %s968_s26  ;;  %p971_p11 = scmp.lt.s32.totalorder %s969_s21, %s963_s25 }
  0x63   : > { %775 = vmatprep.subr.bf16.mxu0 %v895_v2  ;;  %797 = vmatprep.subr.bf16.mxu1 %v895_v2  ;;  %p966_p8 = pneg %p965_p6 }
  0x64   : > { %p972_p0 = por %p971_p11, %p970_p12 }
  0x66   : > { %776 = vmatpush3.bf16.msra.mxu0 %v895_v2  ;;  %805 = vmatpush3.bf16.msra.mxu1 %v895_v2  ;;  %p973_p5 = pnand %p972_p0, %p966_p8 }
  0x67   : > { %777 = vmatprep.subr.bf16.mxu0 %v896_v3  ;;  %798 = vmatprep.subr.bf16.mxu1 %v896_v3 }
  0x6a   : > { %778 = vmatpush3.bf16.msra.mxu0 %v896_v3  ;;  %806 = vmatpush3.bf16.msra.mxu1 %v896_v3 }
  0x6b   : > { %779 = vmatprep.subr.bf16.mxu0 %v897_v6  ;;  %799 = vmatprep.subr.bf16.mxu1 %v897_v6 }
  0x6e   : > { %780 = vmatpush3.bf16.msra.mxu0 %v897_v6  ;;  %807 = vmatpush3.bf16.msra.mxu1 %v897_v6 }
  0x6f   : > { %781 = vmatprep.subr.bf16.mxu0 %v898_v7  ;;  %800 = vmatprep.subr.bf16.mxu1 %v898_v7 }
  0x72   : > { %782 = vmatpush3.bf16.msra.mxu0 %v898_v7  ;;  %808 = vmatpush3.bf16.msra.mxu1 %v898_v7 }
  0x73   : > { %783 = vmatprep.subr.bf16.mxu0 %v899_v8  ;;  %801 = vmatprep.subr.bf16.mxu1 %v899_v8 }
  0x76   : > { %784 = vmatpush3.bf16.msra.mxu0 %v899_v8  ;;  %809 = vmatpush3.bf16.msra.mxu1 %v899_v8 }
  0x77   : > { %785 = vmatprep.subr.bf16.mxu0 %v900_v9  ;;  %802 = vmatprep.subr.bf16.mxu1 %v900_v9 }
  0x7a   : > { %786 = vmatpush3.bf16.msra.mxu0 %v900_v9  ;;  %810 = vmatpush3.bf16.msra.mxu1 %v900_v9 }
  0x7d   : > { %788 = vmatmul.mubr.bf16.vlgmr.msra.gmra.mrb[0].mxu0 %v902_v10  ;;  %792 = vmatmul.mubr.bf16.vlgmr.msra.gmra.mrb[0].mxu1 %v904_v11 }
 0x150   : > { %v789_v12 = vpop.f32.mrb[0].mxu0  ;;  %v1291_v13 = vpop.f32.mrb[0].mxu1 }
 0x151   : > { %v392_v14 = vpop.f32.mrb[1].mxu0  ;;  %v408_v15 = vpop.f32.mrb[1].mxu1  ;;  %v505_v27 = vmul.f32 %v789_v12, %v789_v12 }
 0x152   : > { %v790_v16 = vpop.f32.mrb[2].mxu0  ;;  %v794_v17 = vpop.f32.mrb[2].mxu1  ;;  %v503_v18 = vmul.f32 %v392_v14, %v392_v14 }
 0x153   : > { %v744_v19 = vpack.c.bf16 %v790_v16, %v789_v12  ;;  %v395_v20 = vpop.f32.mrb[3].mxu0  ;;  %v754_v21 = vpack.c.bf16 %v794_v17, %v1291_v13  ;;  %v411_v22 = vpop.f32.mrb[3].mxu1 }
 0x154   : > { %v739_v23 = vpack.c.bf16 %v395_v20, %v392_v14  ;;  %v490_v24 = vadd.f32 %v395_v20, %v392_v14  ;;  %v504_v25 = vmul.f32 %v395_v20, %v395_v20  ;;  %v749_v26 = vpack.c.bf16 %v411_v22, %v408_v15 }
 0x155   : > { %756 = vst [vmem:[%s230_s20 + $0x8] sm:$0xff] %v744_v19   ;;  %758 = vst [vmem:[%s230_s20 + $0x18] sm:$0xff] %v754_v21  }
 0x156   : > { %740 = vst [vmem:[%s230_s20] sm:$0xff] %v739_v23   ;;  %v491_v28 = vadd.f32 %v789_v12, %v490_v24  ;;  %v511_v29 = vadd.f32 %v504_v25, %v503_v18  ;;  %757 = vst [vmem:[%s230_s20 + $0x10] sm:$0xff] %v749_v26  }
 0x157   : > { %976 = shalt.err (!%p973_p5)
}
 0x158   : > { %s977_s4 = scalar_lea.hbm %s1300_s9, 512  ;;  %s981_s7 = scalar_lea.hbm %s1385_s2, 1024 }
 0x159   : > { %p978_p9 = scmp.ne.s32.totalorder %s1300_s9, %s977_s4  ;;  %p982_p3 = scmp.lt.u32.totalorder %s1300_s9, %s1385_s2 }
 0x15a   : > { %p983_p7 = scmp.lt.u32.totalorder %s981_s7, %s977_s4  ;;  %p985_p4 = scmp.lt.u32.totalorder %s977_s4, %s1300_s9 }
 0x15b   : > { %p979_p1 = pnand %p978_p9, %p1210_p10 }
 0x15c   : > { %p984_p13 = por %p983_p7, %p982_p3 }
 0x15d   : > { %p980_p2 = pneg %p979_p1 }
 0x15e   : > { %p986_p6 = por %p985_p4, %p984_p13 }
 0x160   : > { %p987_p8 = pnand %p986_p6, %p980_p2 }
 0x162   : > { %990 = shalt.err (!%p987_p8)
}
 0x163   : > { %s1088_s24 = smov 64   ;;  %s1089_s10 = smov 4   ;;  %v506_v30 = vmul.f32 %v790_v16, %v790_v16  ;;  %v512_v31 = vadd.f32 %v511_v29, %v505_v27  ;;  %v492_v32 = vadd.f32 %v790_v16, %v491_v28  ;;  %v507_v33 = vmul.f32 %v408_v15, %v408_v15 }
 0x164   : > { %817 = dma.vmem_to_hbm [thread:$0]  (%p1210_p10), %s1294_s22, 512, %s1300_s9, %s528_s18, %s1088_s24, %s1088_s24, %s1089_s10   ;;  %v508_v38 = vmul.f32 %v411_v22, %v411_v22  ;;  %v509_v39 = vmul.f32 %v1291_v13, %v1291_v13  ;;  %v510_v42 = vmul.f32 %v794_v17, %v794_v17  ;;  %vm524_vm0 = vcmask 1040384  }
 0x165   : > { %v493_v34 = vadd.f32 %v492_v32, %v408_v15  ;;  %v513_v35 = vadd.f32 %v512_v31, %v506_v30  ;;  %s698_s22 = sshll.u32 %s1269_s30, 1  ;;  %s723_s11 = sshll.u32 %s1073_s15, 5 }
 0x166   : > { %s237_s9 = scalar_lea.vmem [#allocation9], %s698_s22  ;;  %s1334_s26 = scalar_lea.hbm %s1386_s3, %s723_s11 }
 0x167   : > { %v514_v36 = vadd.f32 %v513_v35, %v507_v33  ;;  %v494_v37 = vadd.f32 %v493_v34, %v411_v22  ;;  %s562_s18 = sshll.u32 %s237_s9, 4  ;;  %s533_s21 = scalar_lea.sflag [#allocation10], %s1269_s30  ;;  %s1336_s18 = int_to_ptr.vmem [resolvable:$true] %s562_s18 }
 0x168   : > { %s991_s4 = scalar_lea.vmem %s1336_s18, 32  ;;  %s1090_s15 = smov [#allocation9]  }
 0x169   : > { %v495_v40 = vadd.f32 %v1291_v13, %v494_v37  ;;  %v515_v41 = vadd.f32 %v514_v36, %v508_v38  ;;  %p992_p12 = scmp.ne.s32.totalorder %s1336_s18, %s991_s4  ;;  %s995_s6 = sshll.u32 %s1090_s15, 4  ;;  %s996_s6 = int_to_ptr.vmem [resolvable:$false] %s995_s6 }
 0x16a   : > { %s997_s29 = scalar_lea.vmem %s996_s6, 64  ;;  %p998_p5 = scmp.lt.s32.totalorder %s1336_s18, %s996_s6 }
 0x16b   : > { %v496_v43 = vadd.f32 %v794_v17, %v495_v40  ;;  %v516_v44 = vadd.f32 %v515_v41, %v509_v39  ;;  %p993_p11 = pnand %p992_p12, %p1210_p10  ;;  %p999_p9 = scmp.lt.s32.totalorder %s997_s29, %s991_s4 }
 0x16d   : > { %v497_v45 = vrot.slane %v496_v43, 4  ;;  %v517_v46 = vadd.f32 %v516_v44, %v510_v42  ;;  %p994_p0 = pneg %p993_p11  ;;  %p1000_p1 = por %p999_p9, %p998_p5 }
 0x16f   : > { %v498_v47 = vadd.f32 %v497_v45, %v496_v43  ;;  %v518_v48 = vrot.slane %v517_v46, 4  ;;  %p1001_p2 = pnand %p1000_p1, %p994_p0 }
 0x171   : > { %v499_v49 = vrot.slane %v498_v47, 2  ;;  %v519_v50 = vadd.f32 %v518_v48, %v517_v46 }
 0x173   : > { %v500_v51 = vadd.f32 %v499_v49, %v498_v47  ;;  %v520_v52 = vrot.slane %v519_v50, 2 }
 0x175   : > { %v501_v53 = vrot.slane %v500_v51, 1  ;;  %v521_v54 = vadd.f32 %v520_v52, %v519_v50 }
 0x177   : > { %v522_v55 = vrot.slane %v521_v54, 1  ;;  %v502_v56 = vadd.f32 %v501_v53, %v500_v51 }
 0x179   : > { %v523_v57 = vadd.f32 %v522_v55, %v521_v54 }
 0x17b   : > { %v525_v58 = vsel %vm524_vm0, %v502_v56, %v523_v57 }
 0x17c   : > { %526 = vst [vmem:[%s237_s9] sm:$0x3] %v525_v58 }
 0x17d   : > { %1004 = shalt.err (!%p1001_p2)
}
 0x17e   : > { %s1005_s30 = scalar_lea.hbm %s1334_s26, 32  ;;  %s1009_s20 = scalar_lea.hbm %s1386_s3, 64 }
 0x17f   : > { %p1006_p3 = scmp.ne.s32.totalorder %s1334_s26, %s1005_s30  ;;  %p1010_p4 = scmp.lt.u32.totalorder %s1334_s26, %s1386_s3 }
 0x180   : > { %p1011_p6 = scmp.lt.u32.totalorder %s1009_s20, %s1005_s30  ;;  %p1013_p12 = scmp.lt.u32.totalorder %s1005_s30, %s1334_s26 }
 0x181   : > { %p1007_p7 = pnand %p1006_p3, %p1210_p10 }
 0x182   : > { %p1012_p8 = por %p1011_p6, %p1010_p4 }
 0x183   : > { %p1008_p13 = pneg %p1007_p7 }
 0x184   : > { %p1014_p11 = por %p1013_p12, %p1012_p8 }
 0x186   : > { %p1015_p0 = pnand %p1014_p11, %p1008_p13 }
 0x188   : > { %1018 = shalt.err (!%p1015_p0)
}
 0x189   : > { %818 = dma.vmem_to_hbm [thread:$0]  (%p1210_p10), %s1336_s18, 32, %s1334_s26, %s533_s21  }
 0x18a PF: > { %s574_s22 = sand.u32 1, %s1061_s12   ;;  %p1404_p5 = scmp.ne.s32.totalorder %s1394_s23, 0 }
 0x18b   : > { %p1405_p9 = scmp.ge.s32.totalorder %s1081_s17, 2  ;;  %s575_s11 = scalar_lea.sflag [#allocation5], %s574_s22 }
 0x18d   : > { %p830_p1 = pnand %p1405_p9, %p1404_p5 }
 0x18f   : > { %1052 = dma.done.wait (!%p830_p1), %s575_s11, 512  }
 0x190   : > { %1054 = vsyncadd (!%p830_p1), %s575_s11, 4294966784  ;;  %s584_s9 = scalar_lea.sflag [#allocation10], %s574_s22 }
 0x191   : > { %1056 = dma.done.wait (!%p830_p1), %s584_s9, 32  }
 0x192   : > { %1058 = vsyncadd (!%p830_p1), %s584_s9, 4294967264  ;;  %s24_s17 = sadd.s32 1, %s1081_s17   ;;  %s1406_s12 = smov %s1065_s13 }
 0x193   : > { %p21_p2 = scmp.ge.s32.totalorder %s24_s17, 4   ;;  %s1407_s13 = smov %s1069_s14 }
 0x194   : > { %s1408_s14 = smov %s1219_s5  ;;  %s1409_s15 = smov %s1077_s16 }
 0x195   : > { %s1410_s16 = smov %s1412_s28  ;;  %23 = sbr.rel (!%p21_p2) target bundleno = 9 (0x9), region = 103 }
 0x19c   :  { %589 = vsyncpa [#allocation4], 1 }
 0x19d   :  { %591 = vsyncpa [#allocation4 + $0x1], 1 }
 0x19e   :  { %592 = vsyncpa [#allocation7], 1 }
 0x19f   :  { %593 = vsyncpa [#allocation5], 1 }
 0x1a0   :  { %595 = vsyncpa [#allocation5 + $0x1], 1 }
 0x1a1   :  { %596 = vsyncpa [#allocation10], 1 }
 0x1a2   :  { %598 = vsyncpa [#allocation10 + $0x1], 1 }

</bundles_post_ra>
